<compile_context>
chip_gen: v7x
topology: tpu7x:2x2x1
jax: 0.10.0
libtpu: 0.0.40
codegen_flags: <defaults>
</compile_context>

<pallas_src>
import functools

import jax
import jax.numpy as jnp
import numpy as np
from jax import lax
from jax.experimental import pallas as pl
from jax.experimental.pallas import tpu as pltpu


def _round_up(x, m):
    return ((x + m - 1) // m) * m


def _trilinear_sample_kernel(vert_ref, vol_ref, out_ref, *, C, D, H, W):
    # Block layout:
    #   vol_ref  = (1, C*D, H*W)  (c, d) on sublanes, flattened (h, w) on lanes
    #   vert_ref = (1, 3, Nt)     rows are (x, y, z) normalized coords in [-1, 1]
    #                             (x -> W, y -> H, z -> D, PyTorch grid_sample order)
    #   out_ref  = (1, C, Nt)     transposed back to (B, N, C) in the JAX wrapper
    Nt = vert_ref.shape[-1]
    coords = vert_ref[0]                       # (3, Nt) f32

    x = coords[0:1, :]                         # (1, Nt)
    y = coords[1:2, :]
    z = coords[2:3, :]

    # align_corners=True mapping: [-1, 1] -> [0, size - 1]
    gx = (x + 1.0) * (0.5 * (W - 1))
    gy = (y + 1.0) * (0.5 * (H - 1))
    gz = (z + 1.0) * (0.5 * (D - 1))

    def axis_weights(size, g):
        # Tent function max(0, 1 - |i - g|) over lattice indices i along one
        # spatial axis: exactly the linear-interp weight in-range, and it
        # vanishes for out-of-range corners, implementing padding_mode='zeros'
        # per axis with no floor / int compares / selects.
        i = lax.broadcasted_iota(jnp.int32, (size, Nt), 0).astype(jnp.float32)
        return jnp.maximum(1.0 - jnp.abs(i - g), 0.0)        # (size, Nt)

    Ox = axis_weights(W, gx)                   # (W, Nt)
    Oy = axis_weights(H, gy)                   # (H, Nt)
    Oz = axis_weights(D, gz)                   # (D, Nt)

    # Separable contraction:
    #   out[c, n] = sum_d Oz[d, n] * sum_{h, w} vol[c, d, h, w] * Oy[h, n] * Ox[w, n]
    # 1) small (H*W, Nt) xy-weight matrix (H*W*Nt VPU mults)
    Sxy = (Oy[:, None, :] * Ox[None, :, :]).reshape(H * W, Nt)          # (HW, Nt)
    # 2) one MXU matmul contracts (h, w) for all (c, d) at once
    t = jnp.dot(vol_ref[0], Sxy, preferred_element_type=jnp.float32)    # (C*D, Nt)
    # 3) z-weight and reduce over d (VPU multiply + sublane reduce)
    out_ref[0] = jnp.sum(t.reshape(C, D, Nt) * Oz[None, :, :], axis=1)  # (C, Nt)


def basic_sample(voxel_features, vertices):
    """voxel_features: (B, C, D, H, W) f32; vertices: (B, N, 3) f32 -> (B, N, C)."""
    B, C, D, H, W = voxel_features.shape
    N = vertices.shape[1]
    HW = H * W

    # N tile: multiple of 128, bounded so per-tile intermediates (Sxy, t, axis
    # weights, out) stay well under VMEM even for larger volumes.
    per_pt_bytes = 4 * (HW + C * D + D + H + W + C)
    budget = 12 << 20
    NT = max(128, min(512, (budget // max(per_pt_bytes, 1)) // 128 * 128))
    N_pad = _round_up(max(N, 1), 128)
    if N_pad <= NT:
        NT = N_pad
    else:
        N_pad = _round_up(N, NT)

    # TODO(synk): for volumes too large to keep (C*D, H*W) VMEM-resident
    # (e.g. >=128^3), switch to a DHW-tiled or gather-based variant.
    vol_flat = voxel_features.reshape(B, C * D, HW).astype(jnp.float32)   # glue
    verts_t = jnp.transpose(vertices, (0, 2, 1)).astype(jnp.float32)      # (B, 3, N), glue
    if N_pad != N:
        # Padded points sample the volume center; results are sliced off below.
        verts_t = jnp.pad(verts_t, ((0, 0), (0, 0), (0, N_pad - N)))

    kernel = functools.partial(_trilinear_sample_kernel, C=C, D=D, H=H, W=W)
    out_cn = pl.pallas_call(
        kernel,
        out_shape=jax.ShapeDtypeStruct((B, C, N_pad), jnp.float32),
        grid_spec=pltpu.PrefetchScalarGridSpec(
            num_scalar_prefetch=0,
            grid=(B, N_pad // NT),
            in_specs=[
                pl.BlockSpec((1, 3, NT), lambda b, n: (b, 0, n)),
                # Volume index_map ignores the N-tile axis -> stays VMEM-resident
                # across all N tiles of a batch (DMA'd once per batch element).
                pl.BlockSpec((1, C * D, HW), lambda b, n: (b, 0, 0)),
            ],
            out_specs=pl.BlockSpec((1, C, NT), lambda b, n: (b, 0, n)),
        ),
        compiler_params=pltpu.CompilerParams(
            dimension_semantics=("parallel", "parallel"),
            vmem_limit_bytes=64 << 20,
        ),
    )(verts_t, vol_flat)

    # TODO(synk): drop this transpose if downstream consumers accept (B, C, N);
    # it is an extra HBM pass kept only to match the PyTorch output layout.
    out = jnp.transpose(out_cn, (0, 2, 1))                  # (B, N_pad, C), glue
    return out[:, :N, :]


def basic_sample_ref(vol, verts):
    """Pure-JAX reference of F.grid_sample(..., bilinear, zeros, align_corners=True)."""
    B, C, D, H, W = vol.shape
    DHW = D * H * W
    gx = (verts[..., 0] + 1.0) * 0.5 * (W - 1)
    gy = (verts[..., 1] + 1.0) * 0.5 * (H - 1)
    gz = (verts[..., 2] + 1.0) * 0.5 * (D - 1)
    x0 = jnp.floor(gx)
    y0 = jnp.floor(gy)
    z0 = jnp.floor(gz)
    fx, fy, fz = gx - x0, gy - y0, gz - z0
    vol_flat = vol.reshape(B, C, DHW)
    out = jnp.zeros((B, verts.shape[1], C), jnp.float32)
    for di in (0, 1):
        for dj in (0, 1):
            for dk in (0, 1):
                xi, yj, zk = x0 + di, y0 + dj, z0 + dk
                w = ((fx if di else 1 - fx) * (fy if dj else 1 - fy)
                     * (fz if dk else 1 - fz))
                m = ((xi >= 0) & (xi < W) & (yj >= 0) & (yj < H)
                     & (zk >= 0) & (zk < D)).astype(jnp.float32)
                idx = jnp.clip(((zk * H + yj) * W + xi).astype(jnp.int32), 0, DHW - 1)
                vals = jnp.take_along_axis(vol_flat, idx[:, None, :], axis=2)  # (B,C,N)
                out = out + (w * m)[:, :, None] * jnp.transpose(vals, (0, 2, 1))
    return out


if __name__ == "__main__":
    key = jax.random.PRNGKey(0)
    k1, k2, k3 = jax.random.split(key, 3)
    B, C, D, H, W = 2, 4, 8, 8, 8
    voxel_features = jax.random.normal(k1, (B, C, D, H, W), dtype=jnp.float32)

    # Test 1: N not a multiple of 128 (exercises padding) + out-of-range coords
    # to exercise padding_mode='zeros'.
    N1 = 200
    verts1 = jax.random.uniform(k2, (B, N1, 3), dtype=jnp.float32,
                                minval=-1.2, maxval=1.2)
    out1 = jax.block_until_ready(basic_sample(voxel_features, verts1))
    ref1 = basic_sample_ref(voxel_features, verts1)
    np.testing.assert_allclose(np.asarray(out1), np.asarray(ref1),
                               rtol=1e-5, atol=1e-5)

    # Test 2: multiple N tiles per batch (grid=(B, N_pad//NT)).
    N2 = 1100
    verts2 = jax.random.uniform(k3, (B, N2, 3), dtype=jnp.float32,
                                minval=-1.2, maxval=1.2)
    out2 = jax.block_until_ready(basic_sample(voxel_features, verts2))
    ref2 = basic_sample_ref(voxel_features, verts2)
    np.testing.assert_allclose(np.asarray(out2), np.asarray(ref2),
                               rtol=1e-5, atol=1e-5)

    print("KERNEL_OK")
</pallas_src>

<mosaic_0001>
module attributes {stable_mosaic.version = 11 : i64} {
  func.func @_trilinear_sample_kernel(%arg0: i32, %arg1: i32, %arg2: memref<1x3x256xf32, #tpu.memory_space<vmem>>, %arg3: memref<1x32x64xf32, #tpu.memory_space<vmem>>, %arg4: memref<1x4x256xf32, #tpu.memory_space<vmem>>) attributes {dimension_semantics = [#tpu.dimension_semantics<parallel>, #tpu.dimension_semantics<parallel>], iteration_bounds = array<i64: 2, 1>, scalar_prefetch = 0 : i64, scratch_operands = 0 : i64, tpu.core_type = #tpu.core_type<tc>, window_params = [{transform_indices = @transform_0, window_bounds = array<i64: 1, 3, 256>}, {transform_indices = @transform_1, window_bounds = array<i64: 1, 32, 64>}, {transform_indices = @transform_2, window_bounds = array<i64: 1, 4, 256>}]} {
    %c0 = arith.constant 0 : index
    %c0_0 = arith.constant 0 : index
    %c0_1 = arith.constant 0 : index
    %0 = vector.load %arg2[%c0, %c0_0, %c0_1] : memref<1x3x256xf32, #tpu.memory_space<vmem>>, vector<1x3x256xf32>
    %1 = vector.shape_cast %0 : vector<1x3x256xf32> to vector<3x256xf32>
    %2 = vector.extract_strided_slice %1 {offsets = [0, 0], sizes = [1, 256], strides = [1, 1]} : vector<3x256xf32> to vector<1x256xf32>
    %3 = vector.extract_strided_slice %1 {offsets = [1, 0], sizes = [1, 256], strides = [1, 1]} : vector<3x256xf32> to vector<1x256xf32>
    %4 = vector.extract_strided_slice %1 {offsets = [2, 0], sizes = [1, 256], strides = [1, 1]} : vector<3x256xf32> to vector<1x256xf32>
    %cst = arith.constant 1.000000e+00 : f32
    %5 = vector.broadcast %cst : f32 to vector<1x256xf32>
    %6 = arith.addf %2, %5 : vector<1x256xf32>
    %cst_2 = arith.constant 3.500000e+00 : f32
    %7 = vector.broadcast %cst_2 : f32 to vector<1x256xf32>
    %8 = arith.mulf %6, %7 : vector<1x256xf32>
    %cst_3 = arith.constant 1.000000e+00 : f32
    %9 = vector.broadcast %cst_3 : f32 to vector<1x256xf32>
    %10 = arith.addf %3, %9 : vector<1x256xf32>
    %cst_4 = arith.constant 3.500000e+00 : f32
    %11 = vector.broadcast %cst_4 : f32 to vector<1x256xf32>
    %12 = arith.mulf %10, %11 : vector<1x256xf32>
    %cst_5 = arith.constant 1.000000e+00 : f32
    %13 = vector.broadcast %cst_5 : f32 to vector<1x256xf32>
    %14 = arith.addf %4, %13 : vector<1x256xf32>
    %cst_6 = arith.constant 3.500000e+00 : f32
    %15 = vector.broadcast %cst_6 : f32 to vector<1x256xf32>
    %16 = arith.mulf %14, %15 : vector<1x256xf32>
    %17 = tpu.iota {dimensions = array<i32: 0>} : vector<8x256xi32>
    %18 = arith.sitofp %17 : vector<8x256xi32> to vector<8x256xf32>
    %19 = vector.broadcast %8 : vector<1x256xf32> to vector<8x256xf32>
    %20 = arith.subf %18, %19 : vector<8x256xf32>
    %21 = math.absf %20 : vector<8x256xf32>
    %cst_7 = arith.constant 1.000000e+00 : f32
    %22 = vector.broadcast %cst_7 : f32 to vector<8x256xf32>
    %23 = arith.subf %22, %21 : vector<8x256xf32>
    %cst_8 = arith.constant 0.000000e+00 : f32
    %24 = vector.broadcast %cst_8 : f32 to vector<8x256xf32>
    %25 = arith.maximumf %23, %24 : vector<8x256xf32>
    %26 = tpu.iota {dimensions = array<i32: 0>} : vector<8x256xi32>
    %27 = arith.sitofp %26 : vector<8x256xi32> to vector<8x256xf32>
    %28 = vector.broadcast %12 : vector<1x256xf32> to vector<8x256xf32>
    %29 = arith.subf %27, %28 : vector<8x256xf32>
    %30 = math.absf %29 : vector<8x256xf32>
    %cst_9 = arith.constant 1.000000e+00 : f32
    %31 = vector.broadcast %cst_9 : f32 to vector<8x256xf32>
    %32 = arith.subf %31, %30 : vector<8x256xf32>
    %cst_10 = arith.constant 0.000000e+00 : f32
    %33 = vector.broadcast %cst_10 : f32 to vector<8x256xf32>
    %34 = arith.maximumf %32, %33 : vector<8x256xf32>
    %35 = tpu.iota {dimensions = array<i32: 0>} : vector<8x256xi32>
    %36 = arith.sitofp %35 : vector<8x256xi32> to vector<8x256xf32>
    %37 = vector.broadcast %16 : vector<1x256xf32> to vector<8x256xf32>
    %38 = arith.subf %36, %37 : vector<8x256xf32>
    %39 = math.absf %38 : vector<8x256xf32>
    %cst_11 = arith.constant 1.000000e+00 : f32
    %40 = vector.broadcast %cst_11 : f32 to vector<8x256xf32>
    %41 = arith.subf %40, %39 : vector<8x256xf32>
    %cst_12 = arith.constant 0.000000e+00 : f32
    %42 = vector.broadcast %cst_12 : f32 to vector<8x256xf32>
    %43 = arith.maximumf %41, %42 : vector<8x256xf32>
    %44 = vector.shape_cast %34 : vector<8x256xf32> to vector<8x1x256xf32>
    %45 = vector.shape_cast %25 : vector<8x256xf32> to vector<1x8x256xf32>
    %46 = vector.broadcast %44 : vector<8x1x256xf32> to vector<8x8x256xf32>
    %47 = vector.broadcast %45 : vector<1x8x256xf32> to vector<8x8x256xf32>
    %48 = arith.mulf %46, %47 : vector<8x8x256xf32>
    %49 = vector.shape_cast %48 : vector<8x8x256xf32> to vector<64x256xf32>
    %c0_13 = arith.constant 0 : index
    %c0_14 = arith.constant 0 : index
    %c0_15 = arith.constant 0 : index
    %50 = vector.load %arg3[%c0_13, %c0_14, %c0_15] : memref<1x32x64xf32, #tpu.memory_space<vmem>>, vector<1x32x64xf32>
    %51 = vector.shape_cast %50 : vector<1x32x64xf32> to vector<32x64xf32>
    %cst_16 = arith.constant dense<0.000000e+00> : vector<32x256xf32>
    %52 = tpu.matmul %51, %49, %cst_16 {dimension_numbers = #tpu.dot_dimension_numbers<[1], [0], [0], [1], [0, 0, 1, 1], [], []>} : vector<32x64xf32>, vector<64x256xf32>, vector<32x256xf32> -> vector<32x256xf32>
    %53 = vector.shape_cast %52 : vector<32x256xf32> to vector<4x8x256xf32>
    %54 = vector.shape_cast %43 : vector<8x256xf32> to vector<1x8x256xf32>
    %55 = vector.broadcast %54 : vector<1x8x256xf32> to vector<4x8x256xf32>
    %56 = arith.mulf %53, %55 : vector<4x8x256xf32>
    %cst_17 = arith.constant dense<0.000000e+00> : vector<4x256xf32>
    %57 = vector.multi_reduction <add>, %56, %cst_17 [1] : vector<4x8x256xf32> to vector<4x256xf32>
    %c0_18 = arith.constant 0 : index
    %c0_19 = arith.constant 0 : index
    %c0_20 = arith.constant 0 : index
    %58 = vector.load %arg4[%c0_18, %c0_19, %c0_20] : memref<1x4x256xf32, #tpu.memory_space<vmem>>, vector<1x4x256xf32>
    %59 = vector.shape_cast %58 : vector<1x4x256xf32> to vector<4x256xf32>
    %60 = vector.shape_cast %57 : vector<4x256xf32> to vector<1x4x256xf32>
    tpu.vector_store %arg4[%c0_18, %c0_19, %c0_20], %60 {strides = array<i32>} : memref<1x4x256xf32, #tpu.memory_space<vmem>>, vector<1x4x256xf32>,
    return
  }
  func.func @transform_0(%arg0: i32, %arg1: i32) -> (i32, i32, i32) {
    %c0_i32 = arith.constant 0 : i32
    %c0_i32_0 = arith.constant 0 : i32
    return %arg0, %c0_i32, %arg1 : i32, i32, i32
  }
  func.func @transform_1(%arg0: i32, %arg1: i32) -> (i32, i32, i32) {
    %c0_i32 = arith.constant 0 : i32
    %c0_i32_0 = arith.constant 0 : i32
    %c0_i32_1 = arith.constant 0 : i32
    return %arg0, %c0_i32, %c0_i32_0 : i32, i32, i32
  }
  func.func @transform_2(%arg0: i32, %arg1: i32) -> (i32, i32, i32) {
    %c0_i32 = arith.constant 0 : i32
    %c0_i32_0 = arith.constant 0 : i32
    return %arg0, %c0_i32, %arg1 : i32, i32, i32
  }
}

</mosaic_0001>

<bundles_post_ra>
// kernel: tpu_custom_call.1
= control target key start
LH: loop header
LB: loop body
LE: loop exit
PB: predicated region body
PF: predicated region fallthrough
CT: control target
= control target key end

     0   :  { %7 = vsyncpa [#allocation3], 0  ;;  %s1348_s0 = inlined_call_operand.hbm [shape: f32[2,3,256], index: 0, kind: input, shape index: {}]   ;;  %s1349_s1 = inlined_call_operand.hbm [shape: f32[2,32,64], index: 1, kind: input, shape index: {}]   ;;  %s1350_s2 = inlined_call_operand.hbm [shape: f32[2,4,256], index: 2, kind: output, shape index: {}]  }
   0x1   :  { %9 = vsyncpa [#allocation3 + $0x1], 0 }
   0x2   :  { %10 = vsyncpa [#allocation6], 0 }
   0x3   :  { %12 = vsyncpa [#allocation6 + $0x1], 0 }
   0x4   :  { %13 = vsyncpa [#allocation4], 0 }
   0x5   :  { %15 = vsyncpa [#allocation4 + $0x1], 0  ;;  %s1059_s9 = smov 0   ;;  %s1061_s10 = smov 0  }
   0x6   :  { %s1063_s11 = smov 0   ;;  %s1065_s12 = smov 0  }
   0x7   :  { %s1067_s13 = smov 0   ;;  %s1069_s14 = smov 0  }
   0x8 LB: > { %s768_s15 = sadd.s32 4294967295, %s1035_s14   ;;  %s769_s16 = sadd.s32 4294967294, %s1035_s14   ;;  %s1035_s14 = sphi %s1069_s14, %s21_s14   ;;  %s1031_s13 = sphi %s1067_s13, %s1369_s13   ;;  %s1027_s12 = sphi %s1065_s12, %s1368_s12   ;;  %s1023_s11 = sphi %s1063_s11, %s1367_s11   ;;  %s1019_s10 = sphi %s1061_s10, %s1366_s10   ;;  %s1015_s9 = sphi %s1059_s9, %s1365_s9  }
   0x9   : > { %s33_s17 = sadd.s32 1, %s1031_s13  ;;  %s42_s18 = sadd.s32 1, %s1023_s11 }
   0xa   : > { %p35_p0 = scmp.ge.s32.totalorder %s33_s17, 2  ;;  %p49_p1 = scmp.ne.s32.totalorder %s1023_s11, %s1019_s10 }
   0xb   : > { %p50_p2 = scmp.eq.s32.totalorder %s1035_s14, 0  ;;  %p55_p3 = scmp.ne.s32.totalorder %s1019_s10, %s1015_s9 }
   0xc   : > { %s1371_s17 = smov (%p35_p0, %s33_s17), 0  ;;  %p56_p5 = scmp.eq.s32.totalorder %s768_s15, 0 }
   0xd   : > { %p1100_p4 = por %p50_p2, %p49_p1  ;;  %s37_s20 = ssub.s32 %s1031_s13, %s1371_s17 }
   0xe   : > { %p107_p6 = scmp.eq.s32.totalorder %s768_s15, 1  ;;  %p40_p7 = scmp.eq.s32.totalorder %s37_s20, 0 }
   0xf   : > { %p1106_p8 = por %p56_p5, %p55_p3  ;;  %p113_p10 = scmp.eq.s32.totalorder %s769_s16, 1 }
  0x10   : > { %p1110_p9 = por %p107_p6, %p49_p1  ;;  %p835_p13 = scmp.lt.s32.totalorder %s1035_s14, 2 }
  0x11   : > { %s1354_s21 = scalar_select %p1106_p8, 1, 0 }
  0x12   : > { %s1355_s22 = scalar_select %p1110_p9, 1, 0 }
  0x13   : > { %s1115_s23 = scalar_select %p40_p7, %s1023_s11, %s42_s18  }
  0x14   : > { %p1117_p11 = por %p113_p10, %p55_p3  ;;  %s1124_s25 = sand.u32 1, %s1023_s11  }
  0x15   : > { %s772_s26 = sshll.u32 %s1124_s25, 3  ;;  %s791_s27 = sshll.u32 %s1031_s13, 7 }
  0x16   : > { %s1356_s24 = scalar_select %p1117_p11, 1, 0 }
  0x17   : > { %s1131_s30 = scalar_lea.hbm %s1348_s0, %s791_s27  ;;  %s137_s3 = scalar_lea.vmem [#allocation2], %s772_s26 }
  0x18   : > { %s147_s4 = sshll.u32 %s137_s3, 4  ;;  %p1137_p0 = pnand %p835_p13, %p1100_p4  ;;  %s1133_s4 = int_to_ptr.vmem [resolvable:$true] %s147_s4 }
  0x19   : > { %s134_s6 = scalar_lea.sflag [#allocation3], %s1124_s25  ;;  %s889_s7 = scalar_lea.hbm %s1131_s30, 128 }
  0x1a   : > { %p890_p3 = scmp.ne.s32.totalorder %s1131_s30, %s889_s7  ;;  %p891_p5 = pneg %p1137_p0 }
  0x1b   : > { %s894_s16 = scalar_lea.hbm %s1348_s0, 256  ;;  %p895_p4 = scmp.lt.u32.totalorder %s1131_s30, %s1348_s0 }
  0x1c   : > { %p892_p6 = pnand %p891_p5, %p890_p3  ;;  %p896_p10 = scmp.lt.u32.totalorder %s894_s16, %s889_s7 }
  0x1d   : > { %p898_p12 = scmp.lt.u32.totalorder %s889_s7, %s1131_s30 }
  0x1e   : > { %p893_p7 = pneg %p892_p6  ;;  %p897_p13 = por %p896_p10, %p895_p4 }
  0x20   : > { %p899_p1 = por %p898_p12, %p897_p13 }
  0x22   : > { %p900_p2 = pnand %p899_p1, %p893_p7 }
  0x24   : > { %903 = shalt.err (!%p900_p2)
}
  0x25   : > { %s904_s20 = scalar_lea.vmem %s1133_s4, 128  ;;  %s1037_s26 = smov [#allocation2]  }
  0x26   : > { %p905_p3 = scmp.ne.s32.totalorder %s1133_s4, %s904_s20  ;;  %s909_s27 = sshll.u32 %s1037_s26, 4  ;;  %s910_s27 = int_to_ptr.vmem [resolvable:$false] %s909_s27 }
  0x27   : > { %s911_s28 = scalar_lea.vmem %s910_s27, 256  ;;  %p912_p9 = scmp.lt.s32.totalorder %s1133_s4, %s910_s27 }
  0x28   : > { %p907_p6 = pnand %p905_p3, %p891_p5  ;;  %p913_p4 = scmp.lt.s32.totalorder %s911_s28, %s904_s20 }
  0x2a   : > { %p908_p11 = pneg %p907_p6  ;;  %p914_p10 = por %p913_p4, %p912_p9 }
  0x2c   : > { %p915_p12 = pnand %p914_p10, %p908_p11 }
  0x2e   : > { %918 = shalt.err (!%p915_p12)
}
  0x2f   : > { %827 = dma.hbm_to_vmem [thread:$0]  (!%p1137_p0), %s1131_s30, 128, %s1133_s4, %s134_s6  }
  0x30   : > { %p1358_p1 = scmp.lt.s32.totalorder %s1035_s14, 3  ;;  %p1359_p2 = scmp.ge.s32.totalorder %s1035_s14, 1 }
  0x31   : > { %s775_s3 = sshll.u32 %s1124_s25, 5  ;;  %s792_s7 = sshll.u32 %s1031_s13, 9 }
  0x32   : > { %p1173_p7 = pnand %p1359_p2, %p1358_p1  ;;  %s1182_s16 = scalar_lea.hbm %s1349_s1, %s792_s7 }
  0x33   : > { %s158_s18 = scalar_lea.vmem [#allocation5], %s775_s3  ;;  %s155_s30 = scalar_lea.sflag [#allocation6], %s1124_s25 }
  0x34   : > { %s165_s19 = sshll.u32 %s158_s18, 4  ;;  %s919_s4 = scalar_lea.hbm %s1182_s16, 512  ;;  %s1184_s19 = int_to_ptr.vmem [resolvable:$true] %s165_s19 }
  0x35   : > { %p920_p9 = scmp.ne.s32.totalorder %s1182_s16, %s919_s4  ;;  %s924_s26 = scalar_lea.hbm %s1349_s1, 1024 }
  0x36   : > { %p925_p3 = scmp.lt.u32.totalorder %s1182_s16, %s1349_s1  ;;  %p926_p6 = scmp.lt.u32.totalorder %s924_s26, %s919_s4 }
  0x37   : > { %p922_p11 = pnand %p920_p9, %p891_p5  ;;  %p928_p10 = scmp.lt.u32.totalorder %s919_s4, %s1182_s16 }
  0x38   : > { %p927_p4 = por %p926_p6, %p925_p3 }
  0x39   : > { %p923_p13 = pneg %p922_p11 }
  0x3a   : > { %p929_p12 = por %p928_p10, %p927_p4 }
  0x3c   : > { %p930_p1 = pnand %p929_p12, %p923_p13 }
  0x3e   : > { %933 = shalt.err (!%p930_p1)
}
  0x3f   : > { %s934_s3 = scalar_lea.vmem %s1184_s19, 512  ;;  %s1038_s7 = smov [#allocation5]  }
  0x40   : > { %p935_p2 = scmp.ne.s32.totalorder %s1184_s19, %s934_s3  ;;  %s939_s8 = sshll.u32 %s1038_s7, 4  ;;  %s940_s8 = int_to_ptr.vmem [resolvable:$false] %s939_s8 }
  0x41   : > { %s941_s15 = scalar_lea.vmem %s940_s8, 1024  ;;  %p942_p8 = scmp.lt.s32.totalorder %s1184_s19, %s940_s8 }
  0x42   : > { %p937_p9 = pnand %p935_p2, %p891_p5  ;;  %p943_p3 = scmp.lt.s32.totalorder %s941_s15, %s934_s3 }
  0x44   : > { %p938_p11 = pneg %p937_p9  ;;  %p944_p6 = por %p943_p3, %p942_p8 }
  0x46   : > { %p945_p4 = pnand %p944_p6, %p938_p11 }
  0x48   : > { %948 = shalt.err (!%p945_p4)
}
  0x49   : > { %s1039_s18 = smov 128   ;;  %s1040_s4 = smov 8  }
  0x4a   : > { %830 = dma.hbm_to_vmem [thread:$0]  (!%p1137_p0), %s1182_s16, 512, %s1184_s19, %s155_s30, %s1039_s18, %s1039_s18, %s1040_s4  }
  0x4b   : > { %177 = sbr.rel (%p1173_p7) target bundleno = 389 (0x185), region = 28  ;;  %s1215_s6 = sand.u32 (!%p1173_p7), 1, %s1019_s10  }
  0x4c   : > { %s779_s20 = sshll.u32 (!%p1173_p7), %s1215_s6, 3  ;;  %s180_s26 = scalar_lea.sflag (!%p1173_p7), [#allocation3], %s1215_s6 }
  0x4d   : > { %s183_s27 = scalar_lea.vmem (!%p1173_p7), [#allocation2], %s779_s20  ;;  %p1361_p8 = scmp.ne.s32.totalorder (!%p1173_p7), %s1354_s21, 0 }
  0x52   : > { %1002 = dma.done.wait (%p1361_p8), %s180_s26, 128  }
  0x53   : > { %1004 = vsyncadd (%p1361_p8), %s180_s26, 4294967168  ;;  %s780_s25 = sshll.u32 %s1215_s6, 5  ;;  %s189_s5 = scalar_lea.sflag [#allocation6], %s1215_s6 }
  0x54   : > { %s1227_s29 = scalar_lea.vmem [#allocation5], %s780_s25 }
  0x55   : > { %1006 = dma.done.wait (%p1361_p8), %s189_s5, 512  }
  0x56   : > { %1008 = vsyncadd (%p1361_p8), %s189_s5, 4294966784  ;;  %v223_v0 = vlaneseq  ;;  %v1041_v1 = vmov 0.0   ;;  %v220_v3 = vld [vmem:[%s183_s27] sm:$0x77]  ;;  %v1042_v15 = vmov 1966171168  }
  0x57   : > { %534 = vmatprep.mubr.f32.mxu0 %v1041_v1  ;;  %546 = vmatprep.mubr.f32.mxu1 %v1041_v1  ;;  %v221_v5 = vadd.f32 1.0, %v220_v3  ;;  %v310_v16 = vunpack.c.l.s4 %v1042_v15  ;;  %vm457_vm0 = vcmask 523264   ;;  %vm628_vm1 = vcmask 1041409   ;;  %s793_s21 = sshll.u32 %s1027_s12, 7  ;;  %s217_s16 = scalar_lea.vmem [#allocation7], %s779_s20 }
  0x58   : > { %v1235_v2 = vshrl.u32 %v223_v0, 7  ;;  %vm630_vm2 = vcmask 1045509   ;;  %vm633_vm3 = vcmask 1042434   ;;  %vm635_vm4 = vcmask 1046534   ;;  %s661_s19 = sshll.u32 %s217_s16, 4  ;;  %s1299_s3 = scalar_lea.hbm %s1350_s2, %s793_s21  ;;  %s1301_s19 = int_to_ptr.vmem [resolvable:$true] %s661_s19 }
  0x59   : > { %v1245_v9 = vmul.f32 3.5, %v221_v5  ;;  %v311_v27 = vunpack.c.0.s8 %v310_v16  ;;  %vm638_vm5 = vcmask 1043459   ;;  %vm640_vm6 = vcmask 1047559   ;;  %s645_s12 = scalar_lea.sflag [#allocation4], %s1215_s6  ;;  %s949_s7 = scalar_lea.vmem %s1301_s19, 128 }
  0x5a   : > { %v1238_v4 = vsub.s32 0, %v1235_v2  ;;  %v233_v6 = vsub.s32 4, %v1235_v2  ;;  %v1242_v7 = vsub.s32 1, %v1235_v2  ;;  %v259_v8 = vsub.s32 5, %v1235_v2  ;;  %p950_p0 = scmp.ne.s32.totalorder %s1301_s19, %s949_s7  ;;  %p1362_p5 = scmp.ne.s32.totalorder %s1355_s22, 0 }
  0x5b   : > { %v1248_v10 = vcvt.s32.f32 %v1235_v2  ;;  %v314_v34 = vsub.s32 %v311_v27, %v1235_v2  ;;  %s1043_s8 = smov [#allocation7]  }
  0x5c   : > { %v234_v11 = vrot.slane %v1245_v9, %v233_v6  ;;  %v256_v12 = vrot.slane %v1245_v9, %v1242_v7  ;;  %v260_v13 = vrot.slane %v1245_v9, %v259_v8  ;;  %v230_v14 = vrot.slane %v1245_v9, %v1238_v4  ;;  %p951_p7 = pnand %p950_p0, %p1362_p5  ;;  %s953_s15 = sshll.u32 %s1043_s8, 4  ;;  %s954_s15 = int_to_ptr.vmem [resolvable:$false] %s953_s15 }
  0x5d   : > { %s955_s18 = scalar_lea.vmem %s954_s15, 256  ;;  %p956_p10 = scmp.lt.s32.totalorder %s1301_s19, %s954_s15 }
  0x5e   : > { %v244_v17 = vrot.slane %v234_v11, %v1238_v4  ;;  %v266_v18 = vrot.slane %v256_v12, %v1242_v7  ;;  %v270_v19 = vrot.slane %v260_v13, %v1242_v7  ;;  %v240_v20 = vrot.slane %v230_v14, %v1238_v4  ;;  %p952_p13 = pneg %p951_p7  ;;  %p957_p12 = scmp.lt.s32.totalorder %s955_s18, %s949_s7 }
  0x60   : > { %v246_v21 = vsub.f32 %v1248_v10, %v244_v17  ;;  %v271_v22 = vsub.f32 %v1248_v10, %v266_v18  ;;  %v272_v23 = vsub.f32 %v1248_v10, %v270_v19  ;;  %v245_v24 = vsub.f32 %v1248_v10, %v240_v20  ;;  %p958_p1 = por %p957_p12, %p956_p10 }
  0x62   : > { %v273_v25 = vand.u32 2147483647, %v271_v22  ;;  %v274_v26 = vand.u32 2147483647, %v272_v23  ;;  %v248_v28 = vand.u32 2147483647, %v246_v21  ;;  %p959_p2 = pnand %p958_p1, %p952_p13 }
  0x63   : > { %v247_v29 = vand.u32 2147483647, %v245_v24 }
  0x64   : > { %v275_v30 = vsub.f32 1.0, %v273_v25  ;;  %v276_v31 = vsub.f32 1.0, %v274_v26  ;;  %v250_v35 = vsub.f32 1.0, %v248_v28 }
  0x65   : > { %v249_v36 = vsub.f32 1.0, %v247_v29 }
  0x66   : > { %v277_v32 = vmax.f32 %v275_v30, 0.0  ;;  %v278_v33 = vmax.f32 %v276_v31, 0.0  ;;  %v252_v41 = vmax.f32 %v250_v35, 0.0  ;;  %v454_v35 = vld [vmem:[%s1227_s29 + $0x8] sm:$0xff] }
  0x67   : > { %v251_v42 = vmax.f32 %v249_v36, 0.0  ;;  %v456_v36 = vld [vmem:[%s1227_s29 + $0x18] sm:$0xff] }
  0x68   : > { %v307_v37 = vcombine.low %v277_v32, %v278_v33  ;;  %v308_v38 = vcombine.high %v277_v32, %v278_v33 }
  0x6a   : > { %v315_v39 = vrot.slane %v307_v37, %v314_v34  ;;  %v322_v40 = vrot.slane %v308_v38, %v314_v34  ;;  %v281_v37 = vsub.s32 2, %v1235_v2  ;;  %v285_v38 = vsub.s32 6, %v1235_v2 }
  0x6c   : > { %v323_v43 = vcombine.high %v315_v39, %v315_v39  ;;  %v331_v44 = vrot.slane %v315_v39, %v314_v34  ;;  %v324_v45 = vcombine.high %v322_v40, %v322_v40  ;;  %v338_v46 = vrot.slane %v322_v40, %v314_v34 }
  0x6d   : > { %v282_v39 = vrot.slane %v1245_v9, %v281_v37  ;;  %v286_v40 = vrot.slane %v1245_v9, %v285_v38 }
  0x6e   : > { %v345_v47 = vrot.slane %v323_v43, %v314_v34  ;;  %v364_v48 = vrot.slane %v331_v44, %v1242_v7  ;;  %v360_v49 = vrot.slane %v331_v44, %v1238_v4  ;;  %v353_v50 = vcombine.high %v331_v44, %v331_v44 }
  0x6f   : > { %v352_v51 = vrot.slane %v324_v45, %v314_v34  ;;  %v396_v52 = vrot.slane %v338_v46, %v1242_v7  ;;  %v392_v53 = vrot.slane %v338_v46, %v1238_v4  ;;  %v354_v3 = vcombine.high %v338_v46, %v338_v46  ;;  %v455_v34 = vld [vmem:[%s1227_s29 + $0x10] sm:$0xff] }
  0x70   : > { %v372_v54 = vrot.slane %v345_v47, %v1242_v7  ;;  %v438_v55 = vmul.f32 %v364_v48, %v252_v41  ;;  %v368_v56 = vrot.slane %v345_v47, %v1238_v4  ;;  %v437_v57 = vmul.f32 %v360_v49, %v251_v42 }
  0x71   : > { %v355_v58 = vcombine.high %v345_v47, %v345_v47  ;;  %v380_v59 = vrot.slane %v353_v50, %v1242_v7  ;;  %v376_v60 = vrot.slane %v353_v50, %v1238_v4  ;;  %v404_v61 = vrot.slane %v352_v51, %v1242_v7 }
  0x72   : > { %v440_v62 = vmul.f32 %v372_v54, %v252_v41  ;;  %v439_v63 = vmul.f32 %v368_v56, %v251_v42  ;;  %v400_v0 = vrot.slane %v352_v51, %v1238_v4  ;;  %v446_v14 = vmul.f32 %v396_v52, %v252_v41 }
  0x73   : > { %v388_v5 = vrot.slane %v355_v58, %v1242_v7  ;;  %v442_v6 = vmul.f32 %v380_v59, %v252_v41  ;;  %v384_v8 = vrot.slane %v355_v58, %v1238_v4  ;;  %v441_v11 = vmul.f32 %v376_v60, %v251_v42 }
  0x74   : > { %v794_v12 = vpack.c.bf16 %v440_v62, %v438_v55  ;;  %v796_v13 = vpack.c.bf16 %v439_v63, %v437_v57  ;;  %v448_v15 = vmul.f32 %v404_v61, %v252_v41  ;;  %v356_v18 = vcombine.high %v352_v51, %v352_v51 }
  0x75   : > { %v444_v16 = vmul.f32 %v388_v5, %v252_v41  ;;  %v443_v17 = vmul.f32 %v384_v8, %v251_v42  ;;  %v445_v19 = vmul.f32 %v392_v53, %v251_v42  ;;  %v447_v20 = vmul.f32 %v400_v0, %v251_v42 }
  0x76   : > { %795 = vmatprep.subr.bf16.mxu0 %v794_v12  ;;  %810 = vmatprep.subr.bf16.mxu1 %v794_v12  ;;  %v412_v21 = vrot.slane %v354_v3, %v1242_v7  ;;  %v408_v24 = vrot.slane %v354_v3, %v1238_v4  ;;  %v802_v25 = vpack.c.bf16 %v448_v15, %v446_v14 }
  0x77   : > { %797 = vmatpush1.bf16.msra.mxu0 %v796_v13  ;;  %814 = vmatpush1.bf16.msra.mxu1 %v796_v13  ;;  %v798_v22 = vpack.c.bf16 %v444_v16, %v442_v6  ;;  %v800_v23 = vpack.c.bf16 %v443_v17, %v441_v11  ;;  %v420_v26 = vrot.slane %v356_v18, %v1242_v7 }
  0x78   : > { %v450_v27 = vmul.f32 %v412_v21, %v252_v41  ;;  %v416_v28 = vrot.slane %v356_v18, %v1238_v4  ;;  %v804_v30 = vpack.c.bf16 %v447_v20, %v445_v19  ;;  %v449_v31 = vmul.f32 %v408_v24, %v251_v42  ;;  %v453_v4 = vld [vmem:[%s1227_s29] sm:$0xff] }
  0x79   : > { %799 = vmatprep.subr.bf16.mxu0 %v798_v22  ;;  %811 = vmatprep.subr.bf16.mxu1 %v798_v22  ;;  %v452_v29 = vmul.f32 %v420_v26, %v252_v41  ;;  %v292_v41 = vrot.slane %v282_v39, %v281_v37 }
  0x7a   : > { %v451_v32 = vmul.f32 %v416_v28, %v251_v42  ;;  %v296_v42 = vrot.slane %v286_v40, %v281_v37 }
  0x7b   : > { %801 = vmatpush1.bf16.msra.mxu0 %v800_v23  ;;  %815 = vmatpush1.bf16.msra.mxu1 %v800_v23  ;;  %v806_v33 = vpack.c.bf16 %v452_v29, %v450_v27  ;;  %v297_v43 = vsub.f32 %v1248_v10, %v292_v41 }
  0x7c   : > { %803 = vmatprep.subr.bf16.mxu0 %v802_v25  ;;  %812 = vmatprep.subr.bf16.mxu1 %v802_v25  ;;  %v808_v7 = vpack.c.bf16 %v451_v32, %v449_v31  ;;  %v298_v44 = vsub.f32 %v1248_v10, %v296_v42 }
  0x7d   : > { %v299_v45 = vand.u32 2147483647, %v297_v43 }
  0x7f   : > { %805 = vmatpush1.bf16.msra.mxu0 %v804_v30  ;;  %816 = vmatpush1.bf16.msra.mxu1 %v804_v30  ;;  %v301_v46 = vsub.f32 1.0, %v299_v45 }
  0x80   : > { %807 = vmatprep.subr.bf16.mxu0 %v806_v33  ;;  %813 = vmatprep.subr.bf16.mxu1 %v806_v33 }
  0x81   : > { %v303_v48 = vmax.f32 %v301_v46, 0.0 }
  0x83   : > { %809 = vmatpush1.bf16.msra.mxu0 %v808_v7  ;;  %817 = vmatpush1.bf16.msra.mxu1 %v808_v7 }
  0x86   : > { %782 = vmatmul.mubr.msk.f32.vlgmr.msra.gmra.mrb[0].mxu0 %vm457_vm0, %v453_v4  ;;  %784 = vmatmul.mubr.msk.f32.vlgmr.msra.gmra.mrb[0].mxu1 %vm457_vm0, %v455_v34 }
  0x87   : > { %540 = vmatprep.mubr.f32.mxu0 %v1041_v1  ;;  %552 = vmatprep.mubr.f32.mxu1 %v1041_v1  ;;  %v300_v1 = vand.u32 2147483647, %v298_v44 }
  0x89   : > { %v302_v47 = vsub.f32 1.0, %v300_v1 }
  0x8a   : > { %783 = vmatmul.mubr.msk.f32.gmra.mrb[2].mxu0 %vm457_vm0, %v454_v35  ;;  %785 = vmatmul.mubr.msk.f32.gmra.mrb[2].mxu1 %vm457_vm0, %v456_v36 }
  0x8b   : > { %v304_v49 = vmax.f32 %v302_v47, 0.0 }
 0x159   : > { %v536_v50 = vpop.f32.mrb[0].mxu0  ;;  %v548_v51 = vpop.f32.mrb[0].mxu1 }
 0x15a   : > { %v559_v52 = vmul.f32 %v536_v50, %v303_v48  ;;  %v563_v2 = vmul.f32 %v548_v51, %v303_v48  ;;  %v538_v53 = vpop.f32.mrb[1].mxu0  ;;  %v550_v54 = vpop.f32.mrb[1].mxu1 }
 0x15b   : > { %v560_v55 = vmul.f32 %v538_v53, %v304_v49  ;;  %v564_v9 = vmul.f32 %v550_v54, %v304_v49 }
 0x15c   : > { %v567_v56 = vrot.slane %v559_v52, 4  ;;  %v591_v57 = vrot.slane %v563_v2, 4 }
 0x15d   : > { %v573_v58 = vrot.slane %v560_v55, 4  ;;  %v597_v59 = vrot.slane %v564_v9, 4  ;;  %v542_v60 = vpop.f32.mrb[2].mxu0  ;;  %v554_v10 = vpop.f32.mrb[2].mxu1 }
 0x15e   : > { %v568_v61 = vadd.f32 %v567_v56, %v559_v52  ;;  %v592_v62 = vadd.f32 %v591_v57, %v563_v2  ;;  %v561_v63 = vmul.f32 %v542_v60, %v303_v48  ;;  %v565_v0 = vmul.f32 %v554_v10, %v303_v48  ;;  %v544_v3 = vpop.f32.mrb[3].mxu0  ;;  %v556_v5 = vpop.f32.mrb[3].mxu1 }
 0x15f   : > { %v574_v6 = vadd.f32 %v573_v58, %v560_v55  ;;  %v598_v8 = vadd.f32 %v597_v59, %v564_v9  ;;  %v562_v11 = vmul.f32 %v544_v3, %v304_v49  ;;  %v566_v12 = vmul.f32 %v556_v5, %v304_v49 }
 0x160   : > { %v569_v13 = vrot.slane %v568_v61, 2  ;;  %v593_v14 = vrot.slane %v592_v62, 2  ;;  %v579_v15 = vrot.slane %v561_v63, 4  ;;  %v603_v16 = vrot.slane %v565_v0, 4 }
 0x161   : > { %v575_v17 = vrot.slane %v574_v6, 2  ;;  %v599_v18 = vrot.slane %v598_v8, 2  ;;  %v585_v19 = vrot.slane %v562_v11, 4  ;;  %v609_v20 = vrot.slane %v566_v12, 4 }
 0x162   : > { %v570_v21 = vadd.f32 %v569_v13, %v568_v61  ;;  %v594_v22 = vadd.f32 %v593_v14, %v592_v62  ;;  %v580_v23 = vadd.f32 %v579_v15, %v561_v63  ;;  %v604_v24 = vadd.f32 %v603_v16, %v565_v0 }
 0x163   : > { %v576_v25 = vadd.f32 %v575_v17, %v574_v6  ;;  %v600_v26 = vadd.f32 %v599_v18, %v598_v8  ;;  %v586_v27 = vadd.f32 %v585_v19, %v562_v11  ;;  %v610_v28 = vadd.f32 %v609_v20, %v566_v12 }
 0x164   : > { %v571_v29 = vrot.slane %v570_v21, 1  ;;  %v595_v30 = vrot.slane %v594_v22, 1  ;;  %v581_v31 = vrot.slane %v580_v23, 2  ;;  %v605_v32 = vrot.slane %v604_v24, 2 }
 0x165   : > { %v577_v33 = vrot.slane %v576_v25, 1  ;;  %v601_v7 = vrot.slane %v600_v26, 1  ;;  %v587_v4 = vrot.slane %v586_v27, 2  ;;  %v611_v34 = vrot.slane %v610_v28, 2 }
 0x166   : > { %v572_v35 = vadd.f32 %v571_v29, %v570_v21  ;;  %v596_v36 = vadd.f32 %v595_v30, %v594_v22  ;;  %v582_v37 = vadd.f32 %v581_v31, %v580_v23  ;;  %v606_v38 = vadd.f32 %v605_v32, %v604_v24 }
 0x167   : > { %v578_v39 = vadd.f32 %v577_v33, %v576_v25  ;;  %v602_v40 = vadd.f32 %v601_v7, %v600_v26  ;;  %v588_v41 = vadd.f32 %v587_v4, %v586_v27  ;;  %v612_v42 = vadd.f32 %v611_v34, %v610_v28 }
 0x168   : > { %v583_v43 = vrot.slane %v582_v37, 1  ;;  %v607_v44 = vrot.slane %v606_v38, 1 }
 0x169   : > { %v623_v45 = vcombine.low %v572_v35, %v578_v39  ;;  %v625_v1 = vcombine.low %v596_v36, %v602_v40  ;;  %v589_v46 = vrot.slane %v588_v41, 1  ;;  %v613_v47 = vrot.slane %v612_v42, 1 }
 0x16a   : > { %v584_v48 = vadd.f32 %v583_v43, %v582_v37  ;;  %v608_v49 = vadd.f32 %v607_v44, %v606_v38 }
 0x16b   : > { %v590_v50 = vadd.f32 %v589_v46, %v588_v41  ;;  %v614_v51 = vadd.f32 %v613_v47, %v612_v42  ;;  %v632_v54 = vrot.slane %v625_v1, 6 }
 0x16d   : > { %v624_v52 = vcombine.low %v584_v48, %v590_v50  ;;  %v626_v2 = vcombine.low %v608_v49, %v614_v51 }
 0x16f   : > { %v627_v53 = vrot.slane %v624_v52, 7  ;;  %v637_v56 = vrot.slane %v626_v2, 5 }
 0x171   : > { %v629_v55 = vsel %vm628_vm1, %v627_v53, %v623_v45 }
 0x172   : > { %v631_v9 = vsel %vm630_vm2, %v627_v53, %v629_v55 }
 0x173   : > { %v634_v57 = vsel %vm633_vm3, %v632_v54, %v631_v9 }
 0x174   : > { %v636_v58 = vsel %vm635_vm4, %v632_v54, %v634_v57 }
 0x175   : > { %v639_v59 = vsel %vm638_vm5, %v637_v56, %v636_v58 }
 0x176   : > { %v641_v60 = vsel %vm640_vm6, %v637_v56, %v639_v59 }
 0x177   : > { %643 = vst [vmem:[%s217_s16] sm:$0xff] %v641_v60 }
 0x178   : > { %962 = shalt.err (!%p959_p2)
}
 0x179   : > { %s963_s4 = scalar_lea.hbm %s1299_s3, 128  ;;  %s967_s26 = scalar_lea.hbm %s1350_s2, 256 }
 0x17a   : > { %p964_p9 = scmp.ne.s32.totalorder %s1299_s3, %s963_s4  ;;  %p968_p6 = scmp.lt.u32.totalorder %s1299_s3, %s1350_s2 }
 0x17b   : > { %p969_p4 = scmp.lt.u32.totalorder %s967_s26, %s963_s4  ;;  %p971_p0 = scmp.lt.u32.totalorder %s963_s4, %s1299_s3 }
 0x17c   : > { %p965_p11 = pnand %p964_p9, %p1362_p5 }
 0x17d   : > { %p970_p8 = por %p969_p4, %p968_p6 }
 0x17e   : > { %p966_p3 = pneg %p965_p11 }
 0x17f   : > { %p972_p7 = por %p971_p0, %p970_p8 }
 0x181   : > { %p973_p13 = pnand %p972_p7, %p966_p3 }
 0x183   : > { %976 = shalt.err (!%p973_p13)
}
 0x184   : > { %822 = dma.vmem_to_hbm [thread:$0]  (%p1362_p5), %s1301_s19, 128, %s1299_s3, %s645_s12  }
 0x185 PF: > { %s673_s5 = sand.u32 1, %s1015_s9   ;;  %p1363_p10 = scmp.ne.s32.totalorder %s1356_s24, 0 }
 0x186   : > { %p1364_p12 = scmp.ge.s32.totalorder %s1035_s14, 2  ;;  %s674_s29 = scalar_lea.sflag [#allocation4], %s673_s5 }
 0x188   : > { %p832_p1 = pnand %p1364_p12, %p1363_p10 }
 0x18a   : > { %1010 = dma.done.wait (!%p832_p1), %s674_s29, 128  }
 0x18b   : > { %1012 = vsyncadd (!%p832_p1), %s674_s29, 4294967168  ;;  %s21_s14 = sadd.s32 1, %s1035_s14   ;;  %s1365_s9 = smov %s1019_s10 }
 0x18c   : > { %p18_p2 = scmp.ge.s32.totalorder %s21_s14, 4   ;;  %s1366_s10 = smov %s1023_s11 }
 0x18d   : > { %s1367_s11 = smov %s1115_s23  ;;  %s1368_s12 = smov %s1031_s13 }
 0x18e   : > { %s1369_s13 = smov %s1371_s17  ;;  %20 = sbr.rel (!%p18_p2) target bundleno = 8 (0x8), region = 86 }
 0x195   :  { %679 = vsyncpa [#allocation3], 1 }
 0x196   :  { %681 = vsyncpa [#allocation3 + $0x1], 1 }
 0x197   :  { %682 = vsyncpa [#allocation6], 1 }
 0x198   :  { %684 = vsyncpa [#allocation6 + $0x1], 1 }
 0x199   :  { %685 = vsyncpa [#allocation4], 1 }
 0x19a   :  { %687 = vsyncpa [#allocation4 + $0x1], 1 }

</bundles_post_ra>
